<compile_context>
chip_gen: v7x
topology: tpu7x:2x2x1
jax: 0.10.0
libtpu: 0.0.40
codegen_flags: <defaults>
</compile_context>

<pallas_src>
import functools

import numpy as np
import jax
import jax.numpy as jnp
from jax import lax
from jax.experimental import pallas as pl
from jax.experimental.pallas import tpu as pltpu

NEG = -1e30
LANE_PAD = 128        # tag padding on the lane axis inside the kernel
UNROLL_MAX_SEQ = 256  # statically unroll the Viterbi time loop up to this length


def _round_up(x, m):
    return ((x + m - 1) // m) * m


# ---------------------------------------------------------------------------
# Fused kernel: per-sequence MLP (fc -> ReLU -> classifier) + Viterbi forward
# recursion.  Emissions never leave VMEM.
# ---------------------------------------------------------------------------
def _mate_fused_kernel(x_ref, w1_ref, b1_ref, w2_ref, b2_ref,
                       trans_ref, start_ref, end_ref,
                       hist_ref, final_ref, em_ref,
                       *, num_labels, seq_len):
    lp = em_ref.shape[1]       # 128: tags on lanes (pad lanes biased to NEG)
    lpt = hist_ref.shape[2]    # 8:   compact tag width for HBM outputs

    # ---- MLP: emissions for this sequence (dropout is identity in eval) ----
    x = x_ref[0]                                                       # (S, D)
    h = jnp.dot(x, w1_ref[...], preferred_element_type=jnp.float32) + b1_ref[...]
    h = jnp.maximum(h, 0.0)
    em = jnp.dot(h, w2_ref[...], preferred_element_type=jnp.float32) + b2_ref[...]
    em_ref[...] = em                                                   # stays in VMEM

    # ---- Viterbi forward recursion ------------------------------------------
    hist_ref[0, 0:1, :] = jnp.zeros((1, lpt), jnp.int32)               # t=0 slot unused
    score0 = start_ref[...] + em_ref[0:1, :]                           # (1, LP)
    arg0 = jnp.zeros((1, lp), jnp.int32)                               # hoisted splat

    def step(t, score):
        # cand[i, j] = score[i] + trans[i, j] on a single (8, 128) vreg tile.
        col = jnp.transpose(score)[0:lpt, :]                           # (8, 1)
        cand = col + trans_ref[...]                                    # (8, LP)
        # Fused running max / first-occurrence argmax over the real source tags
        # (pure VPU compare/select — no full XLU reductions per timestep).
        m = cand[0:1, :]
        arg = arg0
        for i in range(1, num_labels):
            c = cand[i:i + 1, :]
            gt = c > m
            arg = jnp.where(gt, i, arg)
            m = jnp.where(gt, c, m)
        hist_ref[0, pl.ds(t, 1), :] = arg[:, 0:lpt]                    # compact history
        return m + em_ref[pl.ds(t, 1), :]

    if seq_len <= UNROLL_MAX_SEQ:
        # Fully unrolled at trace time -> maximal scheduler visibility.
        score = score0
        for t in range(1, seq_len):
            score = step(t, score)
    else:
        score = lax.fori_loop(1, seq_len, step, score0, unroll=8)

    final_ref[0, 0:1, :] = (score + end_ref[...])[:, 0:lpt]


# ---------------------------------------------------------------------------
# Wrapper: pallas_call plumbing
# ---------------------------------------------------------------------------
def mate_decode_device(params, seq_features):
    """Runs the fused kernel; returns (argmax history, final scores) on device."""
    B, S, D = seq_features.shape
    H = params["w1"].shape[1]
    lp = params["w2"].shape[1]
    lpt = params["trans"].shape[0]
    L = int(params["num_labels"])

    kernel = functools.partial(_mate_fused_kernel, num_labels=L, seq_len=S)
    return pl.pallas_call(
        kernel,
        out_shape=(
            jax.ShapeDtypeStruct((B, S, lpt), jnp.int32),    # argmax history
            jax.ShapeDtypeStruct((B, 1, lpt), jnp.float32),  # final scores (+ end)
        ),
        grid_spec=pltpu.PrefetchScalarGridSpec(
            num_scalar_prefetch=0,
            grid=(B,),
            in_specs=[
                pl.BlockSpec((1, S, D), lambda b: (b, 0, 0)),   # this sequence
                pl.BlockSpec((D, H), lambda b: (0, 0)),         # fc weight (resident)
                pl.BlockSpec((1, H), lambda b: (0, 0)),         # fc bias
                pl.BlockSpec((H, lp), lambda b: (0, 0)),        # classifier weight
                pl.BlockSpec((1, lp), lambda b: (0, 0)),        # classifier bias (pad=NEG)
                pl.BlockSpec((lpt, lp), lambda b: (0, 0)),      # CRF transitions
                pl.BlockSpec((1, lp), lambda b: (0, 0)),        # CRF start
                pl.BlockSpec((1, lp), lambda b: (0, 0)),        # CRF end
            ],
            out_specs=(
                pl.BlockSpec((1, S, lpt), lambda b: (b, 0, 0)),
                pl.BlockSpec((1, 1, lpt), lambda b: (b, 0, 0)),
            ),
            scratch_shapes=[pltpu.VMEM((S, lp), jnp.float32)],  # emissions live here
        ),
        compiler_params=pltpu.CompilerParams(
            dimension_semantics=("parallel",)),                 # batch across 2 TCs (v7x)
    )(seq_features.astype(jnp.float32), params["w1"], params["b1"],
      params["w2"], params["b2"], params["trans"], params["start"], params["end"])


def mate_head_forward(params, seq_features):
    """Inference branch of MATEHead.forward (labels=None, mask=None)."""
    B, S, _ = seq_features.shape
    L = int(params["num_labels"])
    hist, final = mate_decode_device(params, seq_features)
    hist = np.asarray(jax.device_get(jax.block_until_ready(hist)))   # (B, S, 8) int32
    fin = np.asarray(jax.device_get(final))[:, 0, :L]                # (B, L)

    # Backtracking: sequential scalar index chase on the compact history
    # (torchcrf's decode does the same loop in Python).
    out = []
    for b in range(B):
        best = int(fin[b].argmax())
        seq = [best]
        for t in range(S - 1, 0, -1):
            best = int(hist[b, t, best])
            seq.append(best)
        seq.reverse()
        out.append(seq)
    return out


# ---------------------------------------------------------------------------
# Parameter packing (pads tags: lanes -> 128 with NEG bias, transitions -> (8,128))
# ---------------------------------------------------------------------------
def pack_params(w1, b1, w2, b2, trans, start, end):
    D, H = w1.shape
    L = w2.shape[1]
    lpt = max(8, _round_up(L, 8))
    w2_p = jnp.zeros((H, LANE_PAD), jnp.float32).at[:, :L].set(w2)
    b2_p = jnp.full((1, LANE_PAD), NEG, jnp.float32).at[0, :L].set(b2)
    trans_p = jnp.full((lpt, LANE_PAD), NEG, jnp.float32).at[:L, :L].set(trans)
    start_p = jnp.full((1, LANE_PAD), NEG, jnp.float32).at[0, :L].set(start)
    end_p = jnp.full((1, LANE_PAD), NEG, jnp.float32).at[0, :L].set(end)
    return dict(num_labels=L,
                w1=w1.astype(jnp.float32), b1=b1.reshape(1, H).astype(jnp.float32),
                w2=w2_p, b2=b2_p, trans=trans_p, start=start_p, end=end_p)


# ---------------------------------------------------------------------------
# Pure numpy reference (emissions MLP + torchcrf-style Viterbi, full mask)
# ---------------------------------------------------------------------------
def reference_forward(raw, seq_features):
    x = np.asarray(seq_features, np.float32)
    h = np.maximum(x @ raw["w1"] + raw["b1"], 0.0)
    em = h @ raw["w2"] + raw["b2"]              # (B, S, L)
    B, S, L = em.shape
    out = []
    for b in range(B):
        score = raw["start"] + em[b, 0]
        hist = []
        for t in range(1, S):
            m = score[:, None] + raw["trans"]   # m[i, j]
            hist.append(m.argmax(0))
            score = m.max(0) + em[b, t]
        score = score + raw["end"]
        best = int(score.argmax())
        seq = [best]
        for idx in reversed(hist):
            best = int(idx[best])
            seq.append(best)
        seq.reverse()
        out.append(seq)
    return out


if __name__ == "__main__":
    B, S, D, L = 2, 8, 32, 3
    H = D  # hidden_dim defaults to input_dim

    key = jax.random.PRNGKey(0)
    k = jax.random.split(key, 8)
    w1 = jax.random.normal(k[0], (D, H), jnp.float32) * 0.1
    b1 = jax.random.normal(k[1], (H,), jnp.float32) * 0.1
    w2 = jax.random.normal(k[2], (H, L), jnp.float32) * 0.1
    b2 = jax.random.normal(k[3], (L,), jnp.float32) * 0.1
    trans = jax.random.uniform(k[4], (L, L), jnp.float32, -0.1, 0.1)
    start = jax.random.uniform(k[5], (L,), jnp.float32, -0.1, 0.1)
    end = jax.random.uniform(k[6], (L,), jnp.float32, -0.1, 0.1)

    params = pack_params(w1, b1, w2, b2, trans, start, end)
    raw = dict(w1=np.asarray(w1), b1=np.asarray(b1), w2=np.asarray(w2),
               b2=np.asarray(b2), trans=np.asarray(trans),
               start=np.asarray(start), end=np.asarray(end))

    seq_features = jax.random.normal(k[7], (B, S, D), jnp.float32)

    pred = mate_head_forward(params, seq_features)
    ref = reference_forward(raw, seq_features)
    assert pred == ref, f"mismatch: {pred} vs {ref}"
    print("KERNEL_OK")
</pallas_src>

<mosaic_0001>
module attributes {stable_mosaic.version = 11 : i64} {
  func.func @_mate_fused_kernel(%arg0: i32, %arg1: memref<1x8x32xf32, #tpu.memory_space<vmem>>, %arg2: memref<32x32xf32, #tpu.memory_space<vmem>>, %arg3: memref<1x32xf32, #tpu.memory_space<vmem>>, %arg4: memref<32x128xf32, #tpu.memory_space<vmem>>, %arg5: memref<1x128xf32, #tpu.memory_space<vmem>>, %arg6: memref<8x128xf32, #tpu.memory_space<vmem>>, %arg7: memref<1x128xf32, #tpu.memory_space<vmem>>, %arg8: memref<1x128xf32, #tpu.memory_space<vmem>>, %arg9: memref<1x8x8xi32, #tpu.memory_space<vmem>>, %arg10: memref<1x1x8xf32, #tpu.memory_space<vmem>>, %arg11: memref<8x128xf32, #tpu.memory_space<vmem>>) attributes {dimension_semantics = [#tpu.dimension_semantics<parallel>], iteration_bounds = array<i64: 2>, scalar_prefetch = 0 : i64, scratch_operands = 1 : i64, tpu.core_type = #tpu.core_type<tc>, window_params = [{transform_indices = @transform_0, window_bounds = array<i64: 1, 8, 32>}, {pipeline_mode = #tpu.pipeline_mode<synchronous>, transform_indices = @transform_1, window_bounds = array<i64: 32, 32>}, {pipeline_mode = #tpu.pipeline_mode<synchronous>, transform_indices = @transform_2, window_bounds = array<i64: 1, 32>}, {pipeline_mode = #tpu.pipeline_mode<synchronous>, transform_indices = @transform_3, window_bounds = array<i64: 32, 128>}, {pipeline_mode = #tpu.pipeline_mode<synchronous>, transform_indices = @transform_4, window_bounds = array<i64: 1, 128>}, {pipeline_mode = #tpu.pipeline_mode<synchronous>, transform_indices = @transform_5, window_bounds = array<i64: 8, 128>}, {pipeline_mode = #tpu.pipeline_mode<synchronous>, transform_indices = @transform_6, window_bounds = array<i64: 1, 128>}, {pipeline_mode = #tpu.pipeline_mode<synchronous>, transform_indices = @transform_7, window_bounds = array<i64: 1, 128>}, {transform_indices = @transform_8, window_bounds = array<i64: 1, 8, 8>}, {transform_indices = @transform_9, window_bounds = array<i64: 1, 1, 8>}]} {
    %c0 = arith.constant 0 : index
    %c0_0 = arith.constant 0 : index
    %c0_1 = arith.constant 0 : index
    %0 = vector.load %arg1[%c0, %c0_0, %c0_1] : memref<1x8x32xf32, #tpu.memory_space<vmem>>, vector<1x8x32xf32>
    %1 = vector.shape_cast %0 : vector<1x8x32xf32> to vector<8x32xf32>
    %c0_2 = arith.constant 0 : index
    %c0_3 = arith.constant 0 : index
    %2 = vector.load %arg2[%c0_2, %c0_3] : memref<32x32xf32, #tpu.memory_space<vmem>>, vector<32x32xf32>
    %cst = arith.constant dense<0.000000e+00> : vector<8x32xf32>
    %3 = tpu.matmul %1, %2, %cst {dimension_numbers = #tpu.dot_dimension_numbers<[1], [0], [0], [1], [0, 0, 1, 1], [], []>} : vector<8x32xf32>, vector<32x32xf32>, vector<8x32xf32> -> vector<8x32xf32>
    %c0_4 = arith.constant 0 : index
    %c0_5 = arith.constant 0 : index
    %4 = vector.load %arg3[%c0_4, %c0_5] : memref<1x32xf32, #tpu.memory_space<vmem>>, vector<1x32xf32>
    %5 = vector.broadcast %4 : vector<1x32xf32> to vector<8x32xf32>
    %6 = arith.addf %3, %5 : vector<8x32xf32>
    %cst_6 = arith.constant 0.000000e+00 : f32
    %7 = vector.broadcast %cst_6 : f32 to vector<8x32xf32>
    %8 = arith.maximumf %6, %7 : vector<8x32xf32>
    %c0_7 = arith.constant 0 : index
    %c0_8 = arith.constant 0 : index
    %9 = vector.load %arg4[%c0_7, %c0_8] : memref<32x128xf32, #tpu.memory_space<vmem>>, vector<32x128xf32>
    %cst_9 = arith.constant dense<0.000000e+00> : vector<8x128xf32>
    %10 = tpu.matmul %8, %9, %cst_9 {dimension_numbers = #tpu.dot_dimension_numbers<[1], [0], [0], [1], [0, 0, 1, 1], [], []>} : vector<8x32xf32>, vector<32x128xf32>, vector<8x128xf32> -> vector<8x128xf32>
    %c0_10 = arith.constant 0 : index
    %c0_11 = arith.constant 0 : index
    %11 = vector.load %arg5[%c0_10, %c0_11] : memref<1x128xf32, #tpu.memory_space<vmem>>, vector<1x128xf32>
    %12 = vector.broadcast %11 : vector<1x128xf32> to vector<8x128xf32>
    %13 = arith.addf %10, %12 : vector<8x128xf32>
    %c0_12 = arith.constant 0 : index
    %c0_13 = arith.constant 0 : index
    %14 = vector.load %arg11[%c0_12, %c0_13] : memref<8x128xf32, #tpu.memory_space<vmem>>, vector<8x128xf32>
    tpu.vector_store %arg11[%c0_12, %c0_13], %13 {strides = array<i32>} : memref<8x128xf32, #tpu.memory_space<vmem>>, vector<8x128xf32>,
    %c0_i32 = arith.constant 0 : i32
    %15 = vector.broadcast %c0_i32 : i32 to vector<1x8xi32>
    %c0_14 = arith.constant 0 : index
    %c0_15 = arith.constant 0 : index
    %c0_16 = arith.constant 0 : index
    %16 = vector.load %arg9[%c0_14, %c0_15, %c0_16] : memref<1x8x8xi32, #tpu.memory_space<vmem>>, vector<1x1x8xi32>
    %17 = vector.shape_cast %16 : vector<1x1x8xi32> to vector<1x8xi32>
    %18 = vector.shape_cast %15 : vector<1x8xi32> to vector<1x1x8xi32>
    tpu.vector_store %arg9[%c0_14, %c0_15, %c0_16], %18 {strides = array<i32>} : memref<1x8x8xi32, #tpu.memory_space<vmem>>, vector<1x1x8xi32>,
    %c0_17 = arith.constant 0 : index
    %c0_18 = arith.constant 0 : index
    %19 = vector.load %arg7[%c0_17, %c0_18] : memref<1x128xf32, #tpu.memory_space<vmem>>, vector<1x128xf32>
    %c0_19 = arith.constant 0 : index
    %c0_20 = arith.constant 0 : index
    %20 = vector.load %arg11[%c0_19, %c0_20] : memref<8x128xf32, #tpu.memory_space<vmem>>, vector<1x128xf32>
    %21 = arith.addf %19, %20 : vector<1x128xf32>
    %c0_i32_21 = arith.constant 0 : i32
    %22 = vector.broadcast %c0_i32_21 : i32 to vector<1x128xi32>
    %23 = tpu.transpose %21, [1, 0] : vector<1x128xf32> -> vector<128x1xf32>
    %24 = vector.extract_strided_slice %23 {offsets = [0, 0], sizes = [8, 1], strides = [1, 1]} : vector<128x1xf32> to vector<8x1xf32>
    %c0_22 = arith.constant 0 : index
    %c0_23 = arith.constant 0 : index
    %25 = vector.load %arg6[%c0_22, %c0_23] : memref<8x128xf32, #tpu.memory_space<vmem>>, vector<8x128xf32>
    %26 = vector.broadcast %24 : vector<8x1xf32> to vector<8x128xf32>
    %27 = arith.addf %26, %25 : vector<8x128xf32>
    %28 = vector.extract_strided_slice %27 {offsets = [0, 0], sizes = [1, 128], strides = [1, 1]} : vector<8x128xf32> to vector<1x128xf32>
    %29 = vector.extract_strided_slice %27 {offsets = [1, 0], sizes = [1, 128], strides = [1, 1]} : vector<8x128xf32> to vector<1x128xf32>
    %30 = arith.cmpf ogt, %29, %28 : vector<1x128xf32>
    %c1_i32 = arith.constant 1 : i32
    %31 = vector.broadcast %c1_i32 : i32 to vector<1x128xi32>
    %32 = arith.select %30, %31, %22 : vector<1x128xi1>, vector<1x128xi32>
    %33 = arith.select %30, %29, %28 : vector<1x128xi1>, vector<1x128xf32>
    %34 = vector.extract_strided_slice %27 {offsets = [2, 0], sizes = [1, 128], strides = [1, 1]} : vector<8x128xf32> to vector<1x128xf32>
    %35 = arith.cmpf ogt, %34, %33 : vector<1x128xf32>
    %c2_i32 = arith.constant 2 : i32
    %36 = vector.broadcast %c2_i32 : i32 to vector<1x128xi32>
    %37 = arith.select %35, %36, %32 : vector<1x128xi1>, vector<1x128xi32>
    %38 = arith.select %35, %34, %33 : vector<1x128xi1>, vector<1x128xf32>
    %39 = vector.extract_strided_slice %37 {offsets = [0, 0], sizes = [1, 8], strides = [1, 1]} : vector<1x128xi32> to vector<1x8xi32>
    %c0_24 = arith.constant 0 : index
    %c1 = arith.constant 1 : index
    %c0_25 = arith.constant 0 : index
    %40 = vector.load %arg9[%c0_24, %c1, %c0_25] : memref<1x8x8xi32, #tpu.memory_space<vmem>>, vector<1x1x8xi32>
    %41 = vector.shape_cast %40 : vector<1x1x8xi32> to vector<1x8xi32>
    %42 = vector.shape_cast %39 : vector<1x8xi32> to vector<1x1x8xi32>
    tpu.vector_store %arg9[%c0_24, %c1, %c0_25], %42 {strides = array<i32>} : memref<1x8x8xi32, #tpu.memory_space<vmem>>, vector<1x1x8xi32>,
    %c1_26 = arith.constant 1 : index
    %c0_27 = arith.constant 0 : index
    %43 = vector.load %arg11[%c1_26, %c0_27] : memref<8x128xf32, #tpu.memory_space<vmem>>, vector<1x128xf32>
    %44 = arith.addf %38, %43 : vector<1x128xf32>
    %45 = tpu.transpose %44, [1, 0] : vector<1x128xf32> -> vector<128x1xf32>
    %46 = vector.extract_strided_slice %45 {offsets = [0, 0], sizes = [8, 1], strides = [1, 1]} : vector<128x1xf32> to vector<8x1xf32>
    %c0_28 = arith.constant 0 : index
    %c0_29 = arith.constant 0 : index
    %47 = vector.load %arg6[%c0_28, %c0_29] : memref<8x128xf32, #tpu.memory_space<vmem>>, vector<8x128xf32>
    %48 = vector.broadcast %46 : vector<8x1xf32> to vector<8x128xf32>
    %49 = arith.addf %48, %47 : vector<8x128xf32>
    %50 = vector.extract_strided_slice %49 {offsets = [0, 0], sizes = [1, 128], strides = [1, 1]} : vector<8x128xf32> to vector<1x128xf32>
    %51 = vector.extract_strided_slice %49 {offsets = [1, 0], sizes = [1, 128], strides = [1, 1]} : vector<8x128xf32> to vector<1x128xf32>
    %52 = arith.cmpf ogt, %51, %50 : vector<1x128xf32>
    %c1_i32_30 = arith.constant 1 : i32
    %53 = vector.broadcast %c1_i32_30 : i32 to vector<1x128xi32>
    %54 = arith.select %52, %53, %22 : vector<1x128xi1>, vector<1x128xi32>
    %55 = arith.select %52, %51, %50 : vector<1x128xi1>, vector<1x128xf32>
    %56 = vector.extract_strided_slice %49 {offsets = [2, 0], sizes = [1, 128], strides = [1, 1]} : vector<8x128xf32> to vector<1x128xf32>
    %57 = arith.cmpf ogt, %56, %55 : vector<1x128xf32>
    %c2_i32_31 = arith.constant 2 : i32
    %58 = vector.broadcast %c2_i32_31 : i32 to vector<1x128xi32>
    %59 = arith.select %57, %58, %54 : vector<1x128xi1>, vector<1x128xi32>
    %60 = arith.select %57, %56, %55 : vector<1x128xi1>, vector<1x128xf32>
    %61 = vector.extract_strided_slice %59 {offsets = [0, 0], sizes = [1, 8], strides = [1, 1]} : vector<1x128xi32> to vector<1x8xi32>
    %c0_32 = arith.constant 0 : index
    %c2 = arith.constant 2 : index
    %c0_33 = arith.constant 0 : index
    %62 = vector.load %arg9[%c0_32, %c2, %c0_33] : memref<1x8x8xi32, #tpu.memory_space<vmem>>, vector<1x1x8xi32>
    %63 = vector.shape_cast %62 : vector<1x1x8xi32> to vector<1x8xi32>
    %64 = vector.shape_cast %61 : vector<1x8xi32> to vector<1x1x8xi32>
    tpu.vector_store %arg9[%c0_32, %c2, %c0_33], %64 {strides = array<i32>} : memref<1x8x8xi32, #tpu.memory_space<vmem>>, vector<1x1x8xi32>,
    %c2_34 = arith.constant 2 : index
    %c0_35 = arith.constant 0 : index
    %65 = vector.load %arg11[%c2_34, %c0_35] : memref<8x128xf32, #tpu.memory_space<vmem>>, vector<1x128xf32>
    %66 = arith.addf %60, %65 : vector<1x128xf32>
    %67 = tpu.transpose %66, [1, 0] : vector<1x128xf32> -> vector<128x1xf32>
    %68 = vector.extract_strided_slice %67 {offsets = [0, 0], sizes = [8, 1], strides = [1, 1]} : vector<128x1xf32> to vector<8x1xf32>
    %c0_36 = arith.constant 0 : index
    %c0_37 = arith.constant 0 : index
    %69 = vector.load %arg6[%c0_36, %c0_37] : memref<8x128xf32, #tpu.memory_space<vmem>>, vector<8x128xf32>
    %70 = vector.broadcast %68 : vector<8x1xf32> to vector<8x128xf32>
    %71 = arith.addf %70, %69 : vector<8x128xf32>
    %72 = vector.extract_strided_slice %71 {offsets = [0, 0], sizes = [1, 128], strides = [1, 1]} : vector<8x128xf32> to vector<1x128xf32>
    %73 = vector.extract_strided_slice %71 {offsets = [1, 0], sizes = [1, 128], strides = [1, 1]} : vector<8x128xf32> to vector<1x128xf32>
    %74 = arith.cmpf ogt, %73, %72 : vector<1x128xf32>
    %c1_i32_38 = arith.constant 1 : i32
    %75 = vector.broadcast %c1_i32_38 : i32 to vector<1x128xi32>
    %76 = arith.select %74, %75, %22 : vector<1x128xi1>, vector<1x128xi32>
    %77 = arith.select %74, %73, %72 : vector<1x128xi1>, vector<1x128xf32>
    %78 = vector.extract_strided_slice %71 {offsets = [2, 0], sizes = [1, 128], strides = [1, 1]} : vector<8x128xf32> to vector<1x128xf32>
    %79 = arith.cmpf ogt, %78, %77 : vector<1x128xf32>
    %c2_i32_39 = arith.constant 2 : i32
    %80 = vector.broadcast %c2_i32_39 : i32 to vector<1x128xi32>
    %81 = arith.select %79, %80, %76 : vector<1x128xi1>, vector<1x128xi32>
    %82 = arith.select %79, %78, %77 : vector<1x128xi1>, vector<1x128xf32>
    %83 = vector.extract_strided_slice %81 {offsets = [0, 0], sizes = [1, 8], strides = [1, 1]} : vector<1x128xi32> to vector<1x8xi32>
    %c0_40 = arith.constant 0 : index
    %c3 = arith.constant 3 : index
    %c0_41 = arith.constant 0 : index
    %84 = vector.load %arg9[%c0_40, %c3, %c0_41] : memref<1x8x8xi32, #tpu.memory_space<vmem>>, vector<1x1x8xi32>
    %85 = vector.shape_cast %84 : vector<1x1x8xi32> to vector<1x8xi32>
    %86 = vector.shape_cast %83 : vector<1x8xi32> to vector<1x1x8xi32>
    tpu.vector_store %arg9[%c0_40, %c3, %c0_41], %86 {strides = array<i32>} : memref<1x8x8xi32, #tpu.memory_space<vmem>>, vector<1x1x8xi32>,
    %c3_42 = arith.constant 3 : index
    %c0_43 = arith.constant 0 : index
    %87 = vector.load %arg11[%c3_42, %c0_43] : memref<8x128xf32, #tpu.memory_space<vmem>>, vector<1x128xf32>
    %88 = arith.addf %82, %87 : vector<1x128xf32>
    %89 = tpu.transpose %88, [1, 0] : vector<1x128xf32> -> vector<128x1xf32>
    %90 = vector.extract_strided_slice %89 {offsets = [0, 0], sizes = [8, 1], strides = [1, 1]} : vector<128x1xf32> to vector<8x1xf32>
    %c0_44 = arith.constant 0 : index
    %c0_45 = arith.constant 0 : index
    %91 = vector.load %arg6[%c0_44, %c0_45] : memref<8x128xf32, #tpu.memory_space<vmem>>, vector<8x128xf32>
    %92 = vector.broadcast %90 : vector<8x1xf32> to vector<8x128xf32>
    %93 = arith.addf %92, %91 : vector<8x128xf32>
    %94 = vector.extract_strided_slice %93 {offsets = [0, 0], sizes = [1, 128], strides = [1, 1]} : vector<8x128xf32> to vector<1x128xf32>
    %95 = vector.extract_strided_slice %93 {offsets = [1, 0], sizes = [1, 128], strides = [1, 1]} : vector<8x128xf32> to vector<1x128xf32>
    %96 = arith.cmpf ogt, %95, %94 : vector<1x128xf32>
    %c1_i32_46 = arith.constant 1 : i32
    %97 = vector.broadcast %c1_i32_46 : i32 to vector<1x128xi32>
    %98 = arith.select %96, %97, %22 : vector<1x128xi1>, vector<1x128xi32>
    %99 = arith.select %96, %95, %94 : vector<1x128xi1>, vector<1x128xf32>
    %100 = vector.extract_strided_slice %93 {offsets = [2, 0], sizes = [1, 128], strides = [1, 1]} : vector<8x128xf32> to vector<1x128xf32>
    %101 = arith.cmpf ogt, %100, %99 : vector<1x128xf32>
    %c2_i32_47 = arith.constant 2 : i32
    %102 = vector.broadcast %c2_i32_47 : i32 to vector<1x128xi32>
    %103 = arith.select %101, %102, %98 : vector<1x128xi1>, vector<1x128xi32>
    %104 = arith.select %101, %100, %99 : vector<1x128xi1>, vector<1x128xf32>
    %105 = vector.extract_strided_slice %103 {offsets = [0, 0], sizes = [1, 8], strides = [1, 1]} : vector<1x128xi32> to vector<1x8xi32>
    %c0_48 = arith.constant 0 : index
    %c4 = arith.constant 4 : index
    %c0_49 = arith.constant 0 : index
    %106 = vector.load %arg9[%c0_48, %c4, %c0_49] : memref<1x8x8xi32, #tpu.memory_space<vmem>>, vector<1x1x8xi32>
    %107 = vector.shape_cast %106 : vector<1x1x8xi32> to vector<1x8xi32>
    %108 = vector.shape_cast %105 : vector<1x8xi32> to vector<1x1x8xi32>
    tpu.vector_store %arg9[%c0_48, %c4, %c0_49], %108 {strides = array<i32>} : memref<1x8x8xi32, #tpu.memory_space<vmem>>, vector<1x1x8xi32>,
    %c4_50 = arith.constant 4 : index
    %c0_51 = arith.constant 0 : index
    %109 = vector.load %arg11[%c4_50, %c0_51] : memref<8x128xf32, #tpu.memory_space<vmem>>, vector<1x128xf32>
    %110 = arith.addf %104, %109 : vector<1x128xf32>
    %111 = tpu.transpose %110, [1, 0] : vector<1x128xf32> -> vector<128x1xf32>
    %112 = vector.extract_strided_slice %111 {offsets = [0, 0], sizes = [8, 1], strides = [1, 1]} : vector<128x1xf32> to vector<8x1xf32>
    %c0_52 = arith.constant 0 : index
    %c0_53 = arith.constant 0 : index
    %113 = vector.load %arg6[%c0_52, %c0_53] : memref<8x128xf32, #tpu.memory_space<vmem>>, vector<8x128xf32>
    %114 = vector.broadcast %112 : vector<8x1xf32> to vector<8x128xf32>
    %115 = arith.addf %114, %113 : vector<8x128xf32>
    %116 = vector.extract_strided_slice %115 {offsets = [0, 0], sizes = [1, 128], strides = [1, 1]} : vector<8x128xf32> to vector<1x128xf32>
    %117 = vector.extract_strided_slice %115 {offsets = [1, 0], sizes = [1, 128], strides = [1, 1]} : vector<8x128xf32> to vector<1x128xf32>
    %118 = arith.cmpf ogt, %117, %116 : vector<1x128xf32>
    %c1_i32_54 = arith.constant 1 : i32
    %119 = vector.broadcast %c1_i32_54 : i32 to vector<1x128xi32>
    %120 = arith.select %118, %119, %22 : vector<1x128xi1>, vector<1x128xi32>
    %121 = arith.select %118, %117, %116 : vector<1x128xi1>, vector<1x128xf32>
    %122 = vector.extract_strided_slice %115 {offsets = [2, 0], sizes = [1, 128], strides = [1, 1]} : vector<8x128xf32> to vector<1x128xf32>
    %123 = arith.cmpf ogt, %122, %121 : vector<1x128xf32>
    %c2_i32_55 = arith.constant 2 : i32
    %124 = vector.broadcast %c2_i32_55 : i32 to vector<1x128xi32>
    %125 = arith.select %123, %124, %120 : vector<1x128xi1>, vector<1x128xi32>
    %126 = arith.select %123, %122, %121 : vector<1x128xi1>, vector<1x128xf32>
    %127 = vector.extract_strided_slice %125 {offsets = [0, 0], sizes = [1, 8], strides = [1, 1]} : vector<1x128xi32> to vector<1x8xi32>
    %c0_56 = arith.constant 0 : index
    %c5 = arith.constant 5 : index
    %c0_57 = arith.constant 0 : index
    %128 = vector.load %arg9[%c0_56, %c5, %c0_57] : memref<1x8x8xi32, #tpu.memory_space<vmem>>, vector<1x1x8xi32>
    %129 = vector.shape_cast %128 : vector<1x1x8xi32> to vector<1x8xi32>
    %130 = vector.shape_cast %127 : vector<1x8xi32> to vector<1x1x8xi32>
    tpu.vector_store %arg9[%c0_56, %c5, %c0_57], %130 {strides = array<i32>} : memref<1x8x8xi32, #tpu.memory_space<vmem>>, vector<1x1x8xi32>,
    %c5_58 = arith.constant 5 : index
    %c0_59 = arith.constant 0 : index
    %131 = vector.load %arg11[%c5_58, %c0_59] : memref<8x128xf32, #tpu.memory_space<vmem>>, vector<1x128xf32>
    %132 = arith.addf %126, %131 : vector<1x128xf32>
    %133 = tpu.transpose %132, [1, 0] : vector<1x128xf32> -> vector<128x1xf32>
    %134 = vector.extract_strided_slice %133 {offsets = [0, 0], sizes = [8, 1], strides = [1, 1]} : vector<128x1xf32> to vector<8x1xf32>
    %c0_60 = arith.constant 0 : index
    %c0_61 = arith.constant 0 : index
    %135 = vector.load %arg6[%c0_60, %c0_61] : memref<8x128xf32, #tpu.memory_space<vmem>>, vector<8x128xf32>
    %136 = vector.broadcast %134 : vector<8x1xf32> to vector<8x128xf32>
    %137 = arith.addf %136, %135 : vector<8x128xf32>
    %138 = vector.extract_strided_slice %137 {offsets = [0, 0], sizes = [1, 128], strides = [1, 1]} : vector<8x128xf32> to vector<1x128xf32>
    %139 = vector.extract_strided_slice %137 {offsets = [1, 0], sizes = [1, 128], strides = [1, 1]} : vector<8x128xf32> to vector<1x128xf32>
    %140 = arith.cmpf ogt, %139, %138 : vector<1x128xf32>
    %c1_i32_62 = arith.constant 1 : i32
    %141 = vector.broadcast %c1_i32_62 : i32 to vector<1x128xi32>
    %142 = arith.select %140, %141, %22 : vector<1x128xi1>, vector<1x128xi32>
    %143 = arith.select %140, %139, %138 : vector<1x128xi1>, vector<1x128xf32>
    %144 = vector.extract_strided_slice %137 {offsets = [2, 0], sizes = [1, 128], strides = [1, 1]} : vector<8x128xf32> to vector<1x128xf32>
    %145 = arith.cmpf ogt, %144, %143 : vector<1x128xf32>
    %c2_i32_63 = arith.constant 2 : i32
    %146 = vector.broadcast %c2_i32_63 : i32 to vector<1x128xi32>
    %147 = arith.select %145, %146, %142 : vector<1x128xi1>, vector<1x128xi32>
    %148 = arith.select %145, %144, %143 : vector<1x128xi1>, vector<1x128xf32>
    %149 = vector.extract_strided_slice %147 {offsets = [0, 0], sizes = [1, 8], strides = [1, 1]} : vector<1x128xi32> to vector<1x8xi32>
    %c0_64 = arith.constant 0 : index
    %c6 = arith.constant 6 : index
    %c0_65 = arith.constant 0 : index
    %150 = vector.load %arg9[%c0_64, %c6, %c0_65] : memref<1x8x8xi32, #tpu.memory_space<vmem>>, vector<1x1x8xi32>
    %151 = vector.shape_cast %150 : vector<1x1x8xi32> to vector<1x8xi32>
    %152 = vector.shape_cast %149 : vector<1x8xi32> to vector<1x1x8xi32>
    tpu.vector_store %arg9[%c0_64, %c6, %c0_65], %152 {strides = array<i32>} : memref<1x8x8xi32, #tpu.memory_space<vmem>>, vector<1x1x8xi32>,
    %c6_66 = arith.constant 6 : index
    %c0_67 = arith.constant 0 : index
    %153 = vector.load %arg11[%c6_66, %c0_67] : memref<8x128xf32, #tpu.memory_space<vmem>>, vector<1x128xf32>
    %154 = arith.addf %148, %153 : vector<1x128xf32>
    %155 = tpu.transpose %154, [1, 0] : vector<1x128xf32> -> vector<128x1xf32>
    %156 = vector.extract_strided_slice %155 {offsets = [0, 0], sizes = [8, 1], strides = [1, 1]} : vector<128x1xf32> to vector<8x1xf32>
    %c0_68 = arith.constant 0 : index
    %c0_69 = arith.constant 0 : index
    %157 = vector.load %arg6[%c0_68, %c0_69] : memref<8x128xf32, #tpu.memory_space<vmem>>, vector<8x128xf32>
    %158 = vector.broadcast %156 : vector<8x1xf32> to vector<8x128xf32>
    %159 = arith.addf %158, %157 : vector<8x128xf32>
    %160 = vector.extract_strided_slice %159 {offsets = [0, 0], sizes = [1, 128], strides = [1, 1]} : vector<8x128xf32> to vector<1x128xf32>
    %161 = vector.extract_strided_slice %159 {offsets = [1, 0], sizes = [1, 128], strides = [1, 1]} : vector<8x128xf32> to vector<1x128xf32>
    %162 = arith.cmpf ogt, %161, %160 : vector<1x128xf32>
    %c1_i32_70 = arith.constant 1 : i32
    %163 = vector.broadcast %c1_i32_70 : i32 to vector<1x128xi32>
    %164 = arith.select %162, %163, %22 : vector<1x128xi1>, vector<1x128xi32>
    %165 = arith.select %162, %161, %160 : vector<1x128xi1>, vector<1x128xf32>
    %166 = vector.extract_strided_slice %159 {offsets = [2, 0], sizes = [1, 128], strides = [1, 1]} : vector<8x128xf32> to vector<1x128xf32>
    %167 = arith.cmpf ogt, %166, %165 : vector<1x128xf32>
    %c2_i32_71 = arith.constant 2 : i32
    %168 = vector.broadcast %c2_i32_71 : i32 to vector<1x128xi32>
    %169 = arith.select %167, %168, %164 : vector<1x128xi1>, vector<1x128xi32>
    %170 = arith.select %167, %166, %165 : vector<1x128xi1>, vector<1x128xf32>
    %171 = vector.extract_strided_slice %169 {offsets = [0, 0], sizes = [1, 8], strides = [1, 1]} : vector<1x128xi32> to vector<1x8xi32>
    %c0_72 = arith.constant 0 : index
    %c7 = arith.constant 7 : index
    %c0_73 = arith.constant 0 : index
    %172 = vector.load %arg9[%c0_72, %c7, %c0_73] : memref<1x8x8xi32, #tpu.memory_space<vmem>>, vector<1x1x8xi32>
    %173 = vector.shape_cast %172 : vector<1x1x8xi32> to vector<1x8xi32>
    %174 = vector.shape_cast %171 : vector<1x8xi32> to vector<1x1x8xi32>
    tpu.vector_store %arg9[%c0_72, %c7, %c0_73], %174 {strides = array<i32>} : memref<1x8x8xi32, #tpu.memory_space<vmem>>, vector<1x1x8xi32>,
    %c7_74 = arith.constant 7 : index
    %c0_75 = arith.constant 0 : index
    %175 = vector.load %arg11[%c7_74, %c0_75] : memref<8x128xf32, #tpu.memory_space<vmem>>, vector<1x128xf32>
    %176 = arith.addf %170, %175 : vector<1x128xf32>
    %c0_76 = arith.constant 0 : index
    %c0_77 = arith.constant 0 : index
    %177 = vector.load %arg8[%c0_76, %c0_77] : memref<1x128xf32, #tpu.memory_space<vmem>>, vector<1x128xf32>
    %178 = arith.addf %176, %177 : vector<1x128xf32>
    %179 = vector.extract_strided_slice %178 {offsets = [0, 0], sizes = [1, 8], strides = [1, 1]} : vector<1x128xf32> to vector<1x8xf32>
    %c0_78 = arith.constant 0 : index
    %c0_79 = arith.constant 0 : index
    %c0_80 = arith.constant 0 : index
    %180 = vector.load %arg10[%c0_78, %c0_79, %c0_80] : memref<1x1x8xf32, #tpu.memory_space<vmem>>, vector<1x1x8xf32>
    %181 = vector.shape_cast %180 : vector<1x1x8xf32> to vector<1x8xf32>
    %182 = vector.shape_cast %179 : vector<1x8xf32> to vector<1x1x8xf32>
    tpu.vector_store %arg10[%c0_78, %c0_79, %c0_80], %182 {strides = array<i32>} : memref<1x1x8xf32, #tpu.memory_space<vmem>>, vector<1x1x8xf32>,
    return
  }
  func.func @transform_0(%arg0: i32) -> (i32, i32, i32) {
    %c0_i32 = arith.constant 0 : i32
    %c0_i32_0 = arith.constant 0 : i32
    %c0_i32_1 = arith.constant 0 : i32
    return %arg0, %c0_i32, %c0_i32_0 : i32, i32, i32
  }
  func.func @transform_1(%arg0: i32) -> (i32, i32) {
    %c0_i32 = arith.constant 0 : i32
    %c0_i32_0 = arith.constant 0 : i32
    %c0_i32_1 = arith.constant 0 : i32
    return %c0_i32, %c0_i32_0 : i32, i32
  }
  func.func @transform_2(%arg0: i32) -> (i32, i32) {
    %c0_i32 = arith.constant 0 : i32
    %c0_i32_0 = arith.constant 0 : i32
    %c0_i32_1 = arith.constant 0 : i32
    return %c0_i32, %c0_i32_0 : i32, i32
  }
  func.func @transform_3(%arg0: i32) -> (i32, i32) {
    %c0_i32 = arith.constant 0 : i32
    %c0_i32_0 = arith.constant 0 : i32
    %c0_i32_1 = arith.constant 0 : i32
    return %c0_i32, %c0_i32_0 : i32, i32
  }
  func.func @transform_4(%arg0: i32) -> (i32, i32) {
    %c0_i32 = arith.constant 0 : i32
    %c0_i32_0 = arith.constant 0 : i32
    %c0_i32_1 = arith.constant 0 : i32
    return %c0_i32, %c0_i32_0 : i32, i32
  }
  func.func @transform_5(%arg0: i32) -> (i32, i32) {
    %c0_i32 = arith.constant 0 : i32
    %c0_i32_0 = arith.constant 0 : i32
    %c0_i32_1 = arith.constant 0 : i32
    return %c0_i32, %c0_i32_0 : i32, i32
  }
  func.func @transform_6(%arg0: i32) -> (i32, i32) {
    %c0_i32 = arith.constant 0 : i32
    %c0_i32_0 = arith.constant 0 : i32
    %c0_i32_1 = arith.constant 0 : i32
    return %c0_i32, %c0_i32_0 : i32, i32
  }
  func.func @transform_7(%arg0: i32) -> (i32, i32) {
    %c0_i32 = arith.constant 0 : i32
    %c0_i32_0 = arith.constant 0 : i32
    %c0_i32_1 = arith.constant 0 : i32
    return %c0_i32, %c0_i32_0 : i32, i32
  }
  func.func @transform_8(%arg0: i32) -> (i32, i32, i32) {
    %c0_i32 = arith.constant 0 : i32
    %c0_i32_0 = arith.constant 0 : i32
    %c0_i32_1 = arith.constant 0 : i32
    return %arg0, %c0_i32, %c0_i32_0 : i32, i32, i32
  }
  func.func @transform_9(%arg0: i32) -> (i32, i32, i32) {
    %c0_i32 = arith.constant 0 : i32
    %c0_i32_0 = arith.constant 0 : i32
    %c0_i32_1 = arith.constant 0 : i32
    return %arg0, %c0_i32, %c0_i32_0 : i32, i32, i32
  }
}

</mosaic_0001>

<bundles_post_ra>
// kernel: tpu_custom_call.1
= control target key start
LH: loop header
LB: loop body
LE: loop exit
PB: predicated region body
PF: predicated region fallthrough
CT: control target
= control target key end

     0   :  { %15 = vsyncpa [#allocation4], 0  ;;  %s1869_s0 = inlined_call_operand.hbm [shape: f32[2,8,32], index: 0, kind: input, shape index: {}]   ;;  %s1870_s1 = inlined_call_operand.hbm [shape: f32[32,32], index: 1, kind: input, shape index: {}]   ;;  %s1871_s2 = inlined_call_operand.vmem [shape: f32[1,32], index: 2, kind: input, shape index: {}]   ;;  %s1872_s3 = inlined_call_operand.hbm [shape: f32[32,128], index: 3, kind: input, shape index: {}]   ;;  %s1873_s4 = inlined_call_operand.vmem [shape: f32[1,128], index: 4, kind: input, shape index: {}]   ;;  %s1874_s5 = inlined_call_operand.vmem [shape: f32[8,128], index: 5, kind: input, shape index: {}]   ;;  %s1875_s6 = inlined_call_operand.vmem [shape: f32[1,128], index: 6, kind: input, shape index: {}]   ;;  %s1876_s7 = inlined_call_operand.vmem [shape: f32[1,128], index: 7, kind: input, shape index: {}]   ;;  %s1877_s8 = inlined_call_operand.hbm [shape: s32[2,8,8], index: 8, kind: output, shape index: {0}]   ;;  %s1878_s9 = inlined_call_operand.hbm [shape: f32[2,1,8], index: 9, kind: output, shape index: {1}]  }
   0x1   :  { %17 = vsyncpa [#allocation4 + $0x1], 0 }
   0x2   :  { %18 = vsyncpa [#allocation7], 0 }
   0x3   :  { %19 = vsyncpa [#allocation5], 0 }
   0x4   :  { %21 = vsyncpa [#allocation5 + $0x1], 0 }
   0x5   :  { %22 = vsyncpa [#allocation11], 0 }
   0x6   :  { %24 = vsyncpa [#allocation11 + $0x1], 0  ;;  %s1543_s30 = smov 0   ;;  %s1545_s10 = smov 0  }
   0x7   :  { %s1547_s11 = smov 0   ;;  %s1549_s12 = smov 0  }
   0x8 LB: > { %s1564_s13 = sadd.s32 4294967295, %s1480_s12   ;;  %s1146_s14 = sadd.s32 4294967294, %s1480_s12   ;;  %s1480_s12 = sphi %s1549_s12, %s1904_s12   ;;  %s1476_s11 = sphi %s1547_s11, %s1903_s11   ;;  %s1472_s10 = sphi %s1545_s10, %s1902_s10   ;;  %s1468_s30 = sphi %s1543_s30, %s1901_s30  }
   0x9   : > { %p50_p0 = scmp.ne.s32.totalorder %s1472_s10, %s1468_s30  ;;  %p1879_p1 = scmp.eq.s32.totalorder %s1564_s13, 0 }
   0xa   : > { %p227_p3 = scmp.eq.s32.totalorder %s1146_s14, 1  ;;  %p1147_p5 = scmp.ge.s32.totalorder %s1480_s12, 1 }
   0xb   : > { %p1573_p4 = por %p1879_p1, %p50_p0  ;;  %p260_p7 = scmp.lt.s32.totalorder %s1480_s12, 3 }
   0xc   : > { %p1578_p6 = por %p227_p3, %p50_p0  ;;  %s1482_s18 = smov [#allocation6]  }
   0xd   : > { %s1884_s15 = scalar_select %p1573_p4, 1, 0 }
   0xe   : > { %s1885_s16 = scalar_select %p1578_p6, 1, 0 }
   0xf   : > { %p1583_p8 = pnand %p1147_p5, %p260_p7  ;;  %s272_s19 = sshll.u32 %s1482_s18, 4  ;;  %s1587_s19 = int_to_ptr.vmem [resolvable:$true] %s272_s19 }
  0x10   : > { %1886 = sst [smem:[#allocation16_spill]] %s1885_s16  ;;  %s1483_s21 = smov [#allocation8]  }
  0x11   : > { %p1226_p9 = pneg %p1583_p8  ;;  %s288_s22 = sshll.u32 %s1483_s21, 4  ;;  %s1598_s22 = int_to_ptr.vmem [resolvable:$true] %s288_s22 }
  0x12   : > { %s1292_s25 = scalar_lea.hbm %s1870_s1, 512 }
  0x13   : > { %p1594_p11 = pnand %p1226_p9, %p1879_p1  ;;  %p1293_p12 = scmp.ne.s32.totalorder %s1870_s1, %s1292_s25 }
  0x14   : > { %p1299_p5 = scmp.lt.u32.totalorder %s1292_s25, %s1870_s1 }
  0x15   : > { %p1294_p13 = pneg %p1594_p11 }
  0x17   : > { %p1295_p0 = pnand %p1294_p13, %p1293_p12 }
  0x19   : > { %p1296_p3 = pneg %p1295_p0 }
  0x1b   : > { %p1301_p7 = pnand %p1299_p5, %p1296_p3 }
  0x1d   : > { %1304 = shalt.err (!%p1301_p7)
}
  0x1e   : > { %s1305_s14 = scalar_lea.vmem %s1587_s19, 512  ;;  %p1313_p2 = scmp.lt.s32.totalorder %s1587_s19, %s1587_s19 }
  0x1f   : > { %p1306_p9 = scmp.ne.s32.totalorder %s1587_s19, %s1305_s14  ;;  %p1314_p12 = scmp.lt.s32.totalorder %s1305_s14, %s1305_s14 }
  0x21   : > { %p1308_p10 = pnand %p1306_p9, %p1294_p13  ;;  %p1315_p0 = por %p1314_p12, %p1313_p2 }
  0x23   : > { %p1309_p1 = pneg %p1308_p10 }
  0x25   : > { %p1316_p6 = pnand %p1315_p0, %p1309_p1 }
  0x27   : > { %1319 = shalt.err (!%p1316_p6)
}
  0x28   : > { %s1484_s18 = smov 128   ;;  %s1485_s21 = smov 8  }
  0x29   : > { %1229 = dma.hbm_to_vmem [thread:$0]  (!%p1594_p11), %s1870_s1, 512, %s1587_s19, [#allocation7], %s1484_s18, %s1484_s18, %s1485_s21  }
  0x2a   : > { %s1320_s27 = scalar_lea.hbm %s1872_s3, 512 }
  0x2b   : > { %p1321_p2 = scmp.ne.s32.totalorder %s1872_s3, %s1320_s27  ;;  %p1327_p10 = scmp.lt.u32.totalorder %s1320_s27, %s1872_s3 }
  0x2d   : > { %p1323_p1 = pnand %p1321_p2, %p1294_p13 }
  0x2f   : > { %p1324_p6 = pneg %p1323_p1 }
  0x31   : > { %p1329_p3 = pnand %p1327_p10, %p1324_p6 }
  0x33   : > { %1332 = shalt.err (!%p1329_p3)
}
  0x34   : > { %s1333_s19 = scalar_lea.vmem %s1598_s22, 512  ;;  %p1341_p12 = scmp.lt.s32.totalorder %s1598_s22, %s1598_s22 }
  0x35   : > { %p1334_p5 = scmp.ne.s32.totalorder %s1598_s22, %s1333_s19  ;;  %p1342_p0 = scmp.lt.s32.totalorder %s1333_s19, %s1333_s19 }
  0x37   : > { %p1336_p7 = pnand %p1334_p5, %p1294_p13  ;;  %p1343_p2 = por %p1342_p0, %p1341_p12 }
  0x39   : > { %p1337_p9 = pneg %p1336_p7 }
  0x3b   : > { %p1344_p1 = pnand %p1343_p2, %p1337_p9 }
  0x3d   : > { %1347 = shalt.err (!%p1344_p1)
}
  0x3e   : > { %1232 = dma.hbm_to_vmem [thread:$0]  (!%p1594_p11), %s1872_s3, 512, %s1598_s22, [#allocation7], %s1484_s18, %s1484_s18, %s1485_s21  }
  0x3f   : > { %s1653_s24 = sadd.s32 1, %s1480_s12   ;;  %s37_s20 = sadd.s32 1, %s1476_s11 }
  0x40   : > { %s34_s25 = ssub.s32 %s1480_s12, %s1653_s24  ;;  %p44_p13 = scmp.ne.s32.totalorder %s1476_s11, %s1472_s10 }
  0x41   : > { %p35_p6 = scmp.eq.s32.totalorder %s34_s25, 0  ;;  %p45_p10 = scmp.eq.s32.totalorder %s1480_s12, 0 }
  0x42   : > { %p1889_p3 = scmp.eq.s32.totalorder %s1564_s13, 1  ;;  %p1246_p7 = scmp.lt.s32.totalorder %s1480_s12, 2 }
  0x43   : > { %s1669_s27 = scalar_select %p35_p6, %s1476_s11, %s37_s20  }
  0x44   : > { %p1663_p5 = por %p1889_p3, %p44_p13  ;;  %p46_p9 = por %p45_p10, %p44_p13 }
  0x45   : > { %s314_s28 = sand.u32 1, %s1476_s11   ;;  %s1152_s22 = sshll.u32 %s1480_s12, 7 }
  0x46   : > { %s1890_s26 = scalar_select %p1663_p5, 1, 0 }
  0x47   : > { %s1151_s29 = sshll.u32 %s314_s28, 3  ;;  %s1676_s14 = scalar_lea.hbm %s1869_s0, %s1152_s22 }
  0x48   : > { %s318_s19 = scalar_lea.vmem [#allocation3], %s1151_s29  ;;  %p1680_p11 = pnand %p1246_p7, %p46_p9 }
  0x49   : > { %s325_s16 = sshll.u32 %s318_s19, 4  ;;  %s315_s20 = scalar_lea.sflag [#allocation4], %s314_s28  ;;  %s1678_s16 = int_to_ptr.vmem [resolvable:$true] %s325_s16 }
  0x4a   : > { %s1348_s25 = scalar_lea.hbm %s1676_s14, 128  ;;  %p1350_p0 = pneg %p1680_p11 }
  0x4b   : > { %p1349_p12 = scmp.ne.s32.totalorder %s1676_s14, %s1348_s25  ;;  %s1353_s18 = scalar_lea.hbm %s1869_s0, 256 }
  0x4c   : > { %p1354_p13 = scmp.lt.u32.totalorder %s1676_s14, %s1869_s0  ;;  %p1355_p6 = scmp.lt.u32.totalorder %s1353_s18, %s1348_s25 }
  0x4d   : > { %p1351_p2 = pnand %p1350_p0, %p1349_p12  ;;  %p1357_p3 = scmp.lt.u32.totalorder %s1348_s25, %s1676_s14 }
  0x4e   : > { %p1356_p10 = por %p1355_p6, %p1354_p13 }
  0x4f   : > { %p1352_p1 = pneg %p1351_p2 }
  0x50   : > { %p1358_p7 = por %p1357_p3, %p1356_p10 }
  0x52   : > { %p1359_p9 = pnand %p1358_p7, %p1352_p1 }
  0x54   : > { %1362 = shalt.err (!%p1359_p9)
}
  0x55   : > { %s1363_s28 = scalar_lea.vmem %s1678_s16, 128  ;;  %s1486_s22 = smov [#allocation3]  }
  0x56   : > { %p1364_p12 = scmp.ne.s32.totalorder %s1678_s16, %s1363_s28  ;;  %s1368_s29 = sshll.u32 %s1486_s22, 4  ;;  %s1369_s29 = int_to_ptr.vmem [resolvable:$false] %s1368_s29 }
  0x57   : > { %s1370_s21 = scalar_lea.vmem %s1369_s29, 256  ;;  %p1371_p4 = scmp.lt.s32.totalorder %s1678_s16, %s1369_s29 }
  0x58   : > { %p1366_p2 = pnand %p1364_p12, %p1350_p0  ;;  %p1372_p13 = scmp.lt.s32.totalorder %s1370_s21, %s1363_s28 }
  0x5a   : > { %p1367_p5 = pneg %p1366_p2  ;;  %p1373_p6 = por %p1372_p13, %p1371_p4 }
  0x5c   : > { %p1374_p10 = pnand %p1373_p6, %p1367_p5 }
  0x5e   : > { %1377 = shalt.err (!%p1374_p10)
}
  0x5f   : > { %1236 = dma.hbm_to_vmem [thread:$0]  (!%p1680_p11), %s1676_s14, 128, %s1678_s16, %s315_s20  }
  0x60   : > { %334 = sbr.rel (%p1583_p8) target bundleno = 2488 (0x9b8), region = 52  ;;  %s1712_s25 = sand.u32 (!%p1583_p8), 1, %s1472_s10  }
  0x61   : > { %s1154_s18 = sshll.u32 (!%p1583_p8), %s1712_s25, 3  ;;  %s337_s19 = scalar_lea.sflag (!%p1583_p8), [#allocation4], %s1712_s25 }
  0x62   : > { %s340_s28 = scalar_lea.vmem (!%p1583_p8), [#allocation3], %s1154_s18  ;;  %p1892_p4 = scmp.ne.s32.totalorder (!%p1583_p8), %s1884_s15, 0 }
  0x67   : > { %1451 = dma.done.wait (%p1892_p4), %s337_s19, 128  }
  0x68   : > { %1453 = vsyncadd (%p1892_p4), %s337_s19, 4294967168  ;;  %p1893_p5 = scmp.eq.s32.totalorder %s1564_s13, 0 }
  0x6a   : > { %1455 = dma.done.wait (%p1893_p5), [#allocation7], 1024   ;;  %p1894_p8 = pmov %p1893_p5 }
  0x6b   : > { %v1487_v0 = vmov 0.0|0.0   ;;  %vm1488_vm0 = vmmov 0   ;;  %v1489_v1 = vmov 0.0   ;;  %v388_v2 = vld [vmem:[#allocation6] sm:$0xff]  ;;  %v389_v3 = vld [vmem:[#allocation6 + $0x8] sm:$0xff]  ;;  %v390_v4 = vld [vmem:[#allocation6 + $0x10] sm:$0xff] }
  0x6c   : > { %1457 = vsyncadd (%p1894_p8), [#allocation7], 4294966272  ;;  %1200 = vmatprep.subr.bf16.mxu0 %v1487_v0  ;;  %1186 = vmatprep.mubr.msk.f32.mxu0 %vm1488_vm0, %v1489_v1  ;;  %v1201_v5 = vpack.c.bf16 %v389_v3, %v388_v2  ;;  %v391_v6 = vld [vmem:[#allocation6 + $0x18] sm:$0xff]  ;;  %v474_v7 = vld [vmem:[#allocation8] sm:$0xff]  ;;  %vm399_vm1 = vcmask 261120   ;;  %v1490_v27 = vmov 0  }
  0x6d   : > { %1206 = vmatprep.subr.bf16.mxu1 %v1487_v0  ;;  %1197 = vmatprep.mubr.msk.f32.mxu1 %vm1488_vm0, %v1489_v1  ;;  %v475_v8 = vld [vmem:[#allocation8 + $0x8] sm:$0xff]  ;;  %v1204_v9 = vpack.c.bf16 %v391_v6, %v390_v4  ;;  %v387_v11 = vld [vmem:[%s340_s28] sm:$0xff]  ;;  %vm616_vm3 = vcmask 59394   ;;  %s1745_s21 = scalar_lea.vmem [#allocation9], %s1154_s18  ;;  %vm559_vm15 = vcmask 57344   ;;  %s1164_s18 = sshll.u32 %s1564_s13, 7 }
  0x6e   : > { %1202 = vmatpush3.bf16.msra.mxu0 %v1201_v5  ;;  %v1207_v10 = vpack.c.bf16 %v475_v8, %v474_v7  ;;  %v476_v12 = vld [vmem:[#allocation8 + $0x10] sm:$0xff]  ;;  %v477_v13 = vld [vmem:[#allocation8 + $0x18] sm:$0xff]  ;;  %v1158_v15 = vld [vmem:[%s1871_s2] ss:$0 sm:$0xff]  ;;  %560 = vst.msk [vmem:[%s1745_s21] sm:$0x1] %vm559_vm15, %v1490_v27  ;;  %s1779_s17 = scalar_lea.hbm %s1877_s8, %s1164_s18 }
  0x6f   : > { %1203 = vmatprep.subr.bf16.mxu0 %v1487_v0  ;;  %v1210_v14 = vpack.c.bf16 %v477_v13, %v476_v12  ;;  %v1160_v20 = vld [vmem:[%s1873_s4] ss:$0 sm:$0xff]  ;;  %s1016_s19 = sshll.u32 %s1745_s21, 4  ;;  %s1883_s20 = scalar_lea.vmem [#allocation10], %s1712_s25  ;;  %s1781_s19 = int_to_ptr.vmem [resolvable:$true] %s1016_s19 }
  0x70   : > { %1208 = vmatpush3.bf16.msra.mxu1 %v1207_v10  ;;  %v561_v24 = vld [vmem:[%s1875_s6] sm:$0x1]  ;;  %s1790_s22 = sshll.u32 %s1883_s20, 4  ;;  %s999_s29 = scalar_lea.sflag [#allocation5], %s1712_s25  ;;  %s1824_s22 = int_to_ptr.vmem [resolvable:$true] %s1790_s22 }
  0x71   : > { %1209 = vmatprep.subr.bf16.mxu1 %v1487_v0  ;;  %v1739_v29 = vld [vmem:[%s1874_s5] sm:$0xff]  ;;  %s1378_s18 = scalar_lea.vmem %s1781_s19, 128  ;;  %p1895_p0 = scmp.ne.s32.totalorder %s1890_s26, 0 }
  0x72   : > { %1205 = vmatpush3.bf16.msra.mxu0 %v1204_v9  ;;  %p1379_p11 = scmp.ne.s32.totalorder %s1781_s19, %s1378_s18  ;;  %s1491_s28 = smov [#allocation9]  }
  0x73   : > { %s1382_s15 = sshll.u32 %s1491_s28, 4  ;;  %s1383_s15 = int_to_ptr.vmem [resolvable:$false] %s1382_s15 }
  0x74   : > { %1211 = vmatpush3.bf16.msra.mxu1 %v1210_v14  ;;  %p1380_p1 = pnand %p1379_p11, %p1895_p0  ;;  %s1384_s14 = scalar_lea.vmem %s1383_s15, 256 }
  0x75   : > { %1187 = vmatmul.mubr.msk.f32.vlgmr.msra.gmra.mrb[0].mxu0 %vm399_vm1, %v387_v11  ;;  %p1385_p7 = scmp.lt.s32.totalorder %s1781_s19, %s1383_s15  ;;  %p1386_p9 = scmp.lt.s32.totalorder %s1384_s14, %s1378_s18 }
  0x76   : > { %p1381_p3 = pneg %p1380_p1 }
  0x77   : > { %p1387_p12 = por %p1386_p9, %p1385_p7 }
  0x79   : > { %p1388_p2 = pnand %p1387_p12, %p1381_p3 }
 0x148   : > { %v469_v16 = vpop.f32.mrb[0].mxu0 }
 0x149   : > { %v470_v17 = vadd.f32 %v1158_v15, %v469_v16  ;;  %v1188_v18 = vpop.f32.mrb[1].mxu0 }
 0x14b   : > { %v473_v19 = vmax.f32 %v470_v17, 0.0 }
 0x14d   : > { %1198 = vmatmul.mubr.msk.f32.vlgmr.msra.gmra.mrb[0].mxu1 %vm399_vm1, %v473_v19 }
 0x220   : > { %v554_v21 = vpop.f32.mrb[0].mxu1 }
 0x221   : > { %v555_v22 = vadd.f32 %v1160_v20, %v554_v21  ;;  %v1199_v23 = vpop.f32.mrb[1].mxu1 }
 0x223   : > { %558 = vst [vmem:[#allocation2] sm:$0xff] %v555_v22 }
 0x22a   : > { %v562_v25 = vld [vmem:[#allocation2] sm:$0x1]  ;;  %v618_v34 = vld [vmem:[#allocation2 + $0x1] sm:$0x1]  ;;  %v679_v49 = vld [vmem:[#allocation2 + $0x2] sm:$0x1] }
 0x22b   : > { %v563_v26 = vadd.f32 %v562_v25, %v561_v24  ;;  %v620_v38 = vrot.slane %v618_v34, 6  ;;  %v681_v52 = vrot.slane %v679_v49, 6  ;;  %v740_v63 = vld [vmem:[#allocation2 + $0x3] sm:$0x1]  ;;  %v801_v12 = vld [vmem:[#allocation2 + $0x4] sm:$0x1] }
 0x22c   : > { %v742_v2 = vrot.slane %v740_v63, 6  ;;  %v803_v16 = vrot.slane %v801_v12, 6 }
 0x22d   : > { %564 = vxpose.xlu0.b32.start.end [1/1] (short) (narrow) %v563_v26, 8 }
 0x256   : > { %1290 = vset.pattern.permute.xlu0 %v1490_v27 }
 0x2ad   : > { %v580_v28 = vpop.trf.xlu0 }
 0x2ae   : > { %599 = vperm.xlu0 %1290, %v580_v28   ;;  %v862_v28 = vld [vmem:[#allocation2 + $0x5] sm:$0x1] }
 0x32d   : > { %v600_v30 = vpop.permute.xlu0 %599 }
 0x32e   : > { %v602_v31 = vadd.f32 %v600_v30, %v1739_v29 }
 0x330   : > { %v604_v32 = vrot.slane %v602_v31, 7 }
 0x332   : > { %vm606_vm2 = vcmp.gt.f32.partialorder %v602_v31, %v604_v32 }
 0x333   : > { %v608_v33 = vsel %vm606_vm2, %v602_v31, %v604_v32  ;;  %v607_v35 = vsel %vm606_vm2, 1, %v1490_v27  ;;  %v864_v32 = vrot.slane %v862_v28, 6 }
 0x334   : > { %v610_v36 = vrot.slane %v608_v33, 7  ;;  %v613_v37 = vrot.slane %v607_v35, 7 }
 0x336   : > { %vm612_vm4 = vcmp.gt.f32.partialorder %v602_v31, %v610_v36 }
 0x337   : > { %v615_v39 = vsel %vm612_vm4, %v602_v31, %v610_v36  ;;  %v614_v40 = vsel %vm612_vm4, 2, %v613_v37 }
 0x338   : > { %v622_v41 = vadd.f32 %v620_v38, %v615_v39  ;;  %617 = vst.msk [vmem:[%s1745_s21 - $0x1] sm:$0x4] %vm616_vm3, %v614_v40 }
 0x33a   : > { %v624_v42 = vrot.slane %v622_v41, 2 }
 0x33c   : > { %626 = vxpose.xlu1.b32.start.end [1/1] (short) (narrow) %v624_v42, 8 }
 0x35a   : > { %1291 = vset.pattern.permute.xlu1 %v1490_v27 }
 0x3bc   : > { %v642_v43 = vpop.trf.xlu1 }
 0x3bd   : > { %661 = vperm.xlu1 %1291, %v642_v43   ;;  %v923_v43 = vld [vmem:[#allocation2 + $0x6] sm:$0x1] }
 0x43c   : > { %v662_v44 = vpop.permute.xlu1 %661 }
 0x43d   : > { %v664_v45 = vadd.f32 %v662_v44, %v1739_v29 }
 0x43f   : > { %v666_v46 = vrot.slane %v664_v45, 7 }
 0x441   : > { %vm668_vm5 = vcmp.gt.f32.partialorder %v664_v45, %v666_v46 }
 0x442   : > { %v669_v47 = vsel %vm668_vm5, 1, %v1490_v27  ;;  %v670_v48 = vsel %vm668_vm5, %v664_v45, %v666_v46  ;;  %v925_v46 = vrot.slane %v923_v43, 6 }
 0x443   : > { %v672_v50 = vrot.slane %v670_v48, 7  ;;  %v675_v51 = vrot.slane %v669_v47, 7 }
 0x445   : > { %vm674_vm6 = vcmp.gt.f32.partialorder %v664_v45, %v672_v50 }
 0x446   : > { %v677_v53 = vsel %vm674_vm6, %v664_v45, %v672_v50  ;;  %v676_v54 = vsel %vm674_vm6, 2, %v675_v51 }
 0x447   : > { %v683_v55 = vadd.f32 %v681_v52, %v677_v53  ;;  %678 = vst.msk [vmem:[%s1745_s21] sm:$0x4] %vm616_vm3, %v676_v54 }
 0x449   : > { %v685_v56 = vrot.slane %v683_v55, 2  ;;  %v984_v55 = vld [vmem:[#allocation2 + $0x7] sm:$0x1] }
 0x44b   : > { %687 = vxpose.xlu1.b32.start.end [1/1] (short) (narrow) %v685_v56, 8 }
 0x4cb   : > { %v703_v57 = vpop.trf.xlu1 }
 0x4cc   : > { %722 = vperm.xlu0 %1290, %v703_v57  }
 0x54b   : > { %v723_v58 = vpop.permute.xlu0 %722 }
 0x54c   : > { %v725_v59 = vadd.f32 %v723_v58, %v1739_v29 }
 0x54e   : > { %v727_v60 = vrot.slane %v725_v59, 7 }
 0x550   : > { %vm729_vm7 = vcmp.gt.f32.partialorder %v725_v59, %v727_v60 }
 0x551   : > { %v730_v61 = vsel %vm729_vm7, 1, %v1490_v27  ;;  %v731_v62 = vsel %vm729_vm7, %v725_v59, %v727_v60  ;;  %v986_v60 = vrot.slane %v984_v55, 6 }
 0x552   : > { %v733_v0 = vrot.slane %v731_v62, 7  ;;  %v736_v1 = vrot.slane %v730_v61, 7  ;;  %v1162_v61 = vld [vmem:[%s1876_s7] ss:$0 sm:$0xff] }
 0x554   : > { %vm735_vm8 = vcmp.gt.f32.partialorder %v725_v59, %v733_v0 }
 0x555   : > { %v738_v3 = vsel %vm735_vm8, %v725_v59, %v733_v0  ;;  %v737_v4 = vsel %vm735_vm8, 2, %v736_v1 }
 0x556   : > { %v744_v5 = vadd.f32 %v742_v2, %v738_v3  ;;  %739 = vst.msk [vmem:[%s1745_s21 + $0x1] sm:$0x4] %vm616_vm3, %v737_v4 }
 0x558   : > { %v746_v6 = vrot.slane %v744_v5, 2 }
 0x55a   : > { %748 = vxpose.xlu0.b32.start.end [1/1] (short) (narrow) %v746_v6, 8 }
 0x5da   : > { %v764_v7 = vpop.trf.xlu0 }
 0x5db   : > { %783 = vperm.xlu1 %1291, %v764_v7  }
 0x65a   : > { %v784_v8 = vpop.permute.xlu1 %783 }
 0x65b   : > { %v786_v9 = vadd.f32 %v784_v8, %v1739_v29 }
 0x65d   : > { %v788_v10 = vrot.slane %v786_v9, 7 }
 0x65f   : > { %vm790_vm9 = vcmp.gt.f32.partialorder %v786_v9, %v788_v10 }
 0x660   : > { %v792_v11 = vsel %vm790_vm9, %v786_v9, %v788_v10  ;;  %v791_v13 = vsel %vm790_vm9, 1, %v1490_v27 }
 0x661   : > { %v794_v14 = vrot.slane %v792_v11, 7  ;;  %v797_v15 = vrot.slane %v791_v13, 7 }
 0x663   : > { %vm796_vm10 = vcmp.gt.f32.partialorder %v786_v9, %v794_v14 }
 0x664   : > { %v799_v17 = vsel %vm796_vm10, %v786_v9, %v794_v14  ;;  %v798_v18 = vsel %vm796_vm10, 2, %v797_v15 }
 0x665   : > { %v805_v19 = vadd.f32 %v803_v16, %v799_v17  ;;  %800 = vst.msk [vmem:[%s1745_s21 + $0x2] sm:$0x4] %vm616_vm3, %v798_v18 }
 0x667   : > { %v807_v20 = vrot.slane %v805_v19, 2 }
 0x669   : > { %809 = vxpose.xlu0.b32.start.end [1/1] (short) (narrow) %v807_v20, 8 }
 0x6e9   : > { %v825_v21 = vpop.trf.xlu0 }
 0x6ea   : > { %844 = vperm.xlu0 %1290, %v825_v21  }
 0x769   : > { %v845_v22 = vpop.permute.xlu0 %844 }
 0x76a   : > { %v847_v23 = vadd.f32 %v845_v22, %v1739_v29 }
 0x76c   : > { %v849_v24 = vrot.slane %v847_v23, 7 }
 0x76e   : > { %vm851_vm11 = vcmp.gt.f32.partialorder %v847_v23, %v849_v24 }
 0x76f   : > { %v852_v25 = vsel %vm851_vm11, 1, %v1490_v27  ;;  %v853_v26 = vsel %vm851_vm11, %v847_v23, %v849_v24 }
 0x770   : > { %v855_v30 = vrot.slane %v853_v26, 7  ;;  %v858_v31 = vrot.slane %v852_v25, 7 }
 0x772   : > { %vm857_vm12 = vcmp.gt.f32.partialorder %v847_v23, %v855_v30 }
 0x773   : > { %v860_v33 = vsel %vm857_vm12, %v847_v23, %v855_v30  ;;  %v859_v34 = vsel %vm857_vm12, 2, %v858_v31 }
 0x774   : > { %v866_v35 = vadd.f32 %v864_v32, %v860_v33  ;;  %861 = vst.msk [vmem:[%s1745_s21 + $0x3] sm:$0x4] %vm616_vm3, %v859_v34 }
 0x776   : > { %v868_v36 = vrot.slane %v866_v35, 2 }
 0x778   : > { %870 = vxpose.xlu1.b32.start.end [1/1] (short) (narrow) %v868_v36, 8 }
 0x7f8   : > { %v886_v37 = vpop.trf.xlu1 }
 0x7f9   : > { %905 = vperm.xlu0 %1290, %v886_v37  }
 0x878   : > { %v906_v38 = vpop.permute.xlu0 %905 }
 0x879   : > { %v908_v39 = vadd.f32 %v906_v38, %v1739_v29 }
 0x87b   : > { %v910_v40 = vrot.slane %v908_v39, 7 }
 0x87d   : > { %vm912_vm13 = vcmp.gt.f32.partialorder %v908_v39, %v910_v40 }
 0x87e   : > { %v913_v41 = vsel %vm912_vm13, 1, %v1490_v27  ;;  %v914_v42 = vsel %vm912_vm13, %v908_v39, %v910_v40 }
 0x87f   : > { %v916_v44 = vrot.slane %v914_v42, 7  ;;  %v919_v45 = vrot.slane %v913_v41, 7 }
 0x881   : > { %vm918_vm14 = vcmp.gt.f32.partialorder %v908_v39, %v916_v44 }
 0x882   : > { %v921_v47 = vsel %vm918_vm14, %v908_v39, %v916_v44  ;;  %v920_v48 = vsel %vm918_vm14, 2, %v919_v45 }
 0x883   : > { %v927_v49 = vadd.f32 %v925_v46, %v921_v47  ;;  %922 = vst.msk [vmem:[%s1745_s21 + $0x4] sm:$0x4] %vm616_vm3, %v920_v48 }
 0x885   : > { %v929_v50 = vrot.slane %v927_v49, 2 }
 0x887   : > { %931 = vxpose.xlu0.b32.start.end [1/1] (short) (narrow) %v929_v50, 8 }
 0x907   : > { %v947_v51 = vpop.trf.xlu0 }
 0x908   : > { %966 = vperm.xlu1 %1291, %v947_v51  }
 0x987   : > { %v967_v52 = vpop.permute.xlu1 %966 }
 0x988   : > { %v969_v53 = vadd.f32 %v967_v52, %v1739_v29 }
 0x98a   : > { %v971_v54 = vrot.slane %v969_v53, 7 }
 0x98c   : > { %vm973_vm0 = vcmp.gt.f32.partialorder %v969_v53, %v971_v54 }
 0x98d   : > { %v974_v56 = vsel %vm973_vm0, 1, %v1490_v27  ;;  %v975_v57 = vsel %vm973_vm0, %v969_v53, %v971_v54 }
 0x98e   : > { %v977_v58 = vrot.slane %v975_v57, 7  ;;  %v980_v59 = vrot.slane %v974_v56, 7 }
 0x990   : > { %vm979_vm1 = vcmp.gt.f32.partialorder %v969_v53, %v977_v58 }
 0x991   : > { %v981_v27 = vsel %vm979_vm1, 2, %v980_v59  ;;  %v982_v29 = vsel %vm979_vm1, %v969_v53, %v977_v58 }
 0x992   : > { %983 = vst.msk [vmem:[%s1745_s21 + $0x5] sm:$0x4] %vm616_vm3, %v981_v27  ;;  %v988_v62 = vadd.f32 %v986_v60, %v982_v29 }
 0x993   : > { %1391 = shalt.err (!%p1388_p2)
}
 0x994   : > { %s1392_s21 = scalar_lea.hbm %s1779_s17, 128  ;;  %s1396_s28 = scalar_lea.hbm %s1877_s8, 256 }
 0x995   : > { %p1393_p13 = scmp.ne.s32.totalorder %s1779_s17, %s1392_s21  ;;  %p1397_p4 = scmp.lt.u32.totalorder %s1779_s17, %s1877_s8 }
 0x996   : > { %p1398_p5 = scmp.lt.u32.totalorder %s1396_s28, %s1392_s21  ;;  %p1400_p11 = scmp.lt.u32.totalorder %s1392_s21, %s1779_s17 }
 0x997   : > { %p1394_p6 = pnand %p1393_p13, %p1895_p0 }
 0x998   : > { %p1399_p8 = por %p1398_p5, %p1397_p4 }
 0x999   : > { %p1395_p10 = pneg %p1394_p6 }
 0x99a   : > { %p1401_p1 = por %p1400_p11, %p1399_p8 }
 0x99c   : > { %p1402_p3 = pnand %p1401_p1, %p1395_p10 }
 0x99e   : > { %1405 = shalt.err (!%p1402_p3)
}
 0x99f   : > { %1222 = dma.vmem_to_hbm [thread:$0]  (%p1895_p0), %s1781_s19, 128, %s1779_s17, %s999_s29   ;;  %v996_v63 = vadd.f32 %v1162_v61, %v988_v62 }
 0x9a0   : > { %s1896_s20 = sshll.u32 %s1564_s13, 4  ;;  %s1897_s21 = scalar_lea.vmem [#allocation10], %s1712_s25 }
 0x9a1   : > { %s1821_s14 = scalar_lea.hbm %s1878_s9, %s1896_s20  ;;  %997 = vst.msk [vmem:[%s1897_s21 - $0x2] sm:$0x4] %vm616_vm3, %v996_v63  ;;  %s1004_s16 = scalar_lea.sflag [#allocation11], %s1712_s25 }
 0x9a2   : > { %s1406_s28 = scalar_lea.vmem %s1824_s22, 16  ;;  %s1492_s13 = smov [#allocation10]  }
 0x9a3   : > { %p1407_p7 = scmp.ne.s32.totalorder %s1824_s22, %s1406_s28  ;;  %s1410_s19 = sshll.u32 %s1492_s13, 4  ;;  %s1411_s19 = int_to_ptr.vmem [resolvable:$false] %s1410_s19 }
 0x9a4   : > { %s1412_s17 = scalar_lea.vmem %s1411_s19, 32  ;;  %p1413_p2 = scmp.lt.s32.totalorder %s1824_s22, %s1411_s19 }
 0x9a5   : > { %p1408_p9 = pnand %p1407_p7, %p1895_p0  ;;  %p1414_p13 = scmp.lt.s32.totalorder %s1412_s17, %s1406_s28 }
 0x9a7   : > { %p1409_p12 = pneg %p1408_p9  ;;  %p1415_p6 = por %p1414_p13, %p1413_p2 }
 0x9a9   : > { %p1416_p10 = pnand %p1415_p6, %p1409_p12 }
 0x9ab   : > { %1419 = shalt.err (!%p1416_p10)
}
 0x9ac   : > { %s1420_s25 = scalar_lea.hbm %s1821_s14, 16  ;;  %s1424_s20 = scalar_lea.hbm %s1878_s9, 32 }
 0x9ad   : > { %p1421_p4 = scmp.ne.s32.totalorder %s1821_s14, %s1420_s25  ;;  %p1425_p11 = scmp.lt.u32.totalorder %s1821_s14, %s1878_s9 }
 0x9ae   : > { %p1426_p1 = scmp.lt.u32.totalorder %s1424_s20, %s1420_s25  ;;  %p1428_p7 = scmp.lt.u32.totalorder %s1420_s25, %s1821_s14 }
 0x9af   : > { %p1422_p5 = pnand %p1421_p4, %p1895_p0 }
 0x9b0   : > { %p1427_p3 = por %p1426_p1, %p1425_p11 }
 0x9b1   : > { %p1423_p8 = pneg %p1422_p5 }
 0x9b2   : > { %p1429_p9 = por %p1428_p7, %p1427_p3 }
 0x9b4   : > { %p1430_p12 = pnand %p1429_p9, %p1423_p8 }
 0x9b6   : > { %1433 = shalt.err (!%p1430_p12)
}
 0x9b7   : > { %1223 = dma.vmem_to_hbm [thread:$0]  (%p1895_p0), %s1824_s22, 16, %s1821_s14, %s1004_s16  }
 0x9b8 PF: > { %s1898_s21 = sld [smem:[#allocation16_spill]]  ;;  %s1041_s28 = sand.u32 1, %s1468_s30  }
 0x9b9   : > { %p1900_p13 = scmp.ge.s32.totalorder %s1480_s12, 2  ;;  %s1042_s13 = scalar_lea.sflag [#allocation5], %s1041_s28 }
 0x9be   : > { %p1899_p2 = scmp.ne.s32.totalorder %s1898_s21, 0 }
 0x9c0   : > { %p1238_p6 = pnand %p1900_p13, %p1899_p2 }
 0x9c2   : > { %1459 = dma.done.wait (!%p1238_p6), %s1042_s13, 128  }
 0x9c3   : > { %1461 = vsyncadd (!%p1238_p6), %s1042_s13, 4294967168  ;;  %s1051_s19 = scalar_lea.sflag [#allocation11], %s1041_s28 }
 0x9c4   : > { %1463 = dma.done.wait (!%p1238_p6), %s1051_s19, 16  }
 0x9c5   : > { %1465 = vsyncadd (!%p1238_p6), %s1051_s19, 4294967280  ;;  %p27_p0 = scmp.ge.s32.totalorder %s1653_s24, 4   ;;  %s1901_s30 = smov %s1472_s10 }
 0x9c6   : > { %s1902_s10 = smov %s1476_s11  ;;  %s1903_s11 = smov %s1669_s27 }
 0x9c7   : > { %s1904_s12 = smov %s1653_s24  ;;  %29 = sbr.rel (!%p27_p0) target bundleno = 8 (0x8), region = 122 }
 0x9ce   :  { %1055 = vsyncpa [#allocation4], 1 }
 0x9cf   :  { %1057 = vsyncpa [#allocation4 + $0x1], 1 }
 0x9d0   :  { %1058 = vsyncpa [#allocation7], 1 }
 0x9d1   :  { %1059 = vsyncpa [#allocation5], 1 }
 0x9d2   :  { %1061 = vsyncpa [#allocation5 + $0x1], 1 }
 0x9d3   :  { %1062 = vsyncpa [#allocation11], 1 }
 0x9d4   :  { %1064 = vsyncpa [#allocation11 + $0x1], 1 }

</bundles_post_ra>
